<compile_context>
chip_gen: v7x
topology: tpu7x:2x2x1
jax: 0.10.0
libtpu: 0.0.40
codegen_flags: <defaults>
</compile_context>

<pallas_src>
import functools

import jax
import jax.numpy as jnp
from jax.experimental import pallas as pl
from jax.experimental.pallas import tpu as pltpu

LANE = 128
_MIB = 1 << 20


def _round_up(x, m):
    return ((x + m - 1) // m) * m


def _cdiv(a, b):
    return -(-a // b)


def _vmem_capacity_bytes():
    # Narrow fallback only for the hardware query itself (never masks kernel
    # compile errors): assume the smallest per-core VMEM (v7x, 64 MiB).
    try:
        return int(pltpu.get_tpu_info().vmem_capacity_bytes)
    except Exception:
        return 64 * _MIB


# ----------------------------------------------------------------------------
# Pallas kernel: whole MLP chain for one batch tile.
# n_layers / padded dims are baked in at trace time.
# ----------------------------------------------------------------------------
def mesnet_kernel(n_layers, dims_p, *refs):
    """refs layout (all params fully VMEM-resident, no per-step DMA):
       x_ref        (tm, in_p)               compute dtype
       w0_ref       (in_p, h_p)              compute dtype
       [wstack_ref] (n_layers-1, h_p, h_p)   compute dtype   (only if n_layers > 1)
       wlat_ref     (h_p, lat_p)             compute dtype
       wout_ref     (lat_p, tgt_p)           compute dtype
       b_ref        (n_layers+2, max_fo_p)   f32 (packed biases)
       y_ref        (tm, tgt_p)              out dtype
       lat_ref      (tm, lat_p)              out dtype
    """
    has_stack = n_layers > 1
    it = iter(refs)
    x_ref = next(it)
    w0_ref = next(it)
    wstack_ref = next(it) if has_stack else None
    wlat_ref = next(it)
    wout_ref = next(it)
    b_ref = next(it)
    y_ref = next(it)
    lat_ref = next(it)

    compute_dtype = x_ref.dtype
    biases = b_ref[...]                                # (n_layers+2, max_fo_p) f32

    def bias_row(i, fo_p):                             # static slice -> (1, fo_p)
        return biases[i:i + 1, :fo_p]

    h = x_ref[...]                                     # (tm, in_p), compute dtype

    # Encoder hidden layers: Linear, ReLU after every layer except the last.
    for i in range(n_layers):
        w = w0_ref[...] if i == 0 else wstack_ref[i - 1]
        acc = jnp.dot(h, w, preferred_element_type=jnp.float32)
        acc = acc + bias_row(i, dims_p[i][1])
        h = acc.astype(compute_dtype)                  # feed next MXU matmul
        if i < n_layers - 1:
            # ReLU in compute dtype (bf16 VPU on v6e/v7x); identical result to
            # f32-ReLU-then-cast since the cast preserves sign and zero.
            h = jnp.maximum(h, jnp.zeros((), compute_dtype))

    # Latent projection (no activation before it, matching make_layers).
    latents = jnp.dot(h, wlat_ref[...], preferred_element_type=jnp.float32)
    latents = latents + bias_row(n_layers, dims_p[n_layers][1])

    # Output head.
    y = jnp.dot(latents.astype(compute_dtype), wout_ref[...],
                preferred_element_type=jnp.float32)
    y = y + bias_row(n_layers + 1, dims_p[n_layers + 1][1])

    y_ref[...] = y.astype(y_ref.dtype)                 # lane-dense (128-wide) stores
    lat_ref[...] = latents.astype(lat_ref.dtype)


# ----------------------------------------------------------------------------
# One-time parameter preparation (hoisted out of the per-call path).
# ----------------------------------------------------------------------------
def prepare_mesnet_params(params, n_layers, compute_dtype=jnp.bfloat16):
    """Pad every feature dim to a multiple of 128, cast weights to the compute
    dtype, pack biases into one (n_layers+2, max_out) f32 array and stack the
    same-shape (h,h) hidden weights.  Call once, reuse across forwards."""
    assert n_layers >= 1 and len(params) == n_layers + 2
    dims = tuple((int(w.shape[0]), int(w.shape[1])) for (w, _) in params)
    dims_p = tuple((_round_up(fi, LANE), _round_up(fo, LANE)) for (fi, fo) in dims)
    max_fo_p = max(fo_p for (_, fo_p) in dims_p)

    def pad2(a, rows, cols):
        return jnp.pad(a, ((0, rows - a.shape[0]), (0, cols - a.shape[1])))

    w_pad = [pad2(w, fi_p, fo_p).astype(compute_dtype)
             for (w, _), (fi_p, fo_p) in zip(params, dims_p)]
    b_all = jnp.stack(
        [pad2(b.reshape(1, -1).astype(jnp.float32), 1, max_fo_p)[0]
         for (_, b) in params], axis=0)                 # (n_layers+2, max_fo_p) f32

    weights = [w_pad[0]]
    if n_layers > 1:
        weights.append(jnp.stack(w_pad[1:n_layers], axis=0))  # (n_layers-1, h_p, h_p)
    weights += [w_pad[n_layers], w_pad[n_layers + 1], b_all]

    return dict(weights=tuple(weights), dims=dims, dims_p=dims_p,
                n_layers=n_layers, compute_dtype=compute_dtype)


# ----------------------------------------------------------------------------
# Forward wrapper: balanced batch tiling + pallas_call.
# ----------------------------------------------------------------------------
def mesnet_forward(x, prepared, *, tm=256, out_dtype=jnp.float32):
    """x: (B, input_dim) f32.  prepared: output of prepare_mesnet_params."""
    n_layers = prepared["n_layers"]
    dims, dims_p = prepared["dims"], prepared["dims_p"]
    compute_dtype = prepared["compute_dtype"]
    weights = prepared["weights"]

    B, input_dim = x.shape
    assert input_dim == dims[0][0]
    in_p = dims_p[0][0]
    latent_dim, target_dim = dims[n_layers][1], dims[n_layers + 1][1]
    lat_p, tgt_p = dims_p[n_layers][1], dims_p[n_layers + 1][1]

    # ---- batch tiling: balanced 16-aligned tiles; >=2 grid steps when B >= 32
    # so v7x's two TensorCores both get work on the "parallel" batch axis. ----
    tm = _round_up(min(max(int(tm), 16), 1024), 16)
    B16 = _round_up(B, 16)
    min_tiles = 2 if B16 >= 32 else 1
    n_tiles = max(_cdiv(B16, tm), min_tiles)
    tm = _round_up(_cdiv(B16, n_tiles), 16)            # balanced, 16-row aligned
    Bp = tm * n_tiles
    x_p = jnp.pad(x, ((0, Bp - B), (0, in_p - input_dim))).astype(compute_dtype)
    grid = (n_tiles,)

    # ---- cost estimate + per-generation VMEM budget --------------------------
    out_isz = jnp.dtype(out_dtype).itemsize
    param_bytes = sum(int(w.size) * w.dtype.itemsize for w in weights)
    flops = 2 * Bp * sum(fi * fo for (fi, fo) in dims_p)
    cost = pl.CostEstimate(
        flops=int(flops), transcendentals=0,
        bytes_accessed=int(Bp * in_p * x_p.dtype.itemsize + param_bytes
                           + Bp * (lat_p + tgt_p) * out_isz))

    in_tile = tm * in_p * x_p.dtype.itemsize
    out_tile = tm * (lat_p + tgt_p) * out_isz
    act_bytes = 4 * tm * max(max(fi, fo) for (fi, fo) in dims_p) * 4  # f32 temps
    # Params are single-buffered (whole-array VMEM residency) -> 1x param_bytes;
    # x / outputs are pipelined -> 2x tile bytes.
    vmem_need = 2 * (in_tile + out_tile) + param_bytes + act_bytes
    capacity = _vmem_capacity_bytes()
    vmem_cap = (capacity * 7) // 8     # headroom for compiler scratch / DMA bufs
    vmem_limit = int(min(max(vmem_need + 8 * _MIB, 32 * _MIB), vmem_cap))
    # TODO(synk): if padded params exceed ~half of VMEM (e.g. hidden_dim ~3-4K on
    # v7x's 64 MiB), stream the stacked hidden weights per layer with
    # pltpu.emit_pipeline instead of full VMEM residency.

    x_spec = pl.BlockSpec((tm, in_p), lambda i: (i, 0))
    # Whole-array VMEM residency: one copy, one prologue DMA per parameter.
    param_specs = [pl.BlockSpec(memory_space=pltpu.MemorySpace.VMEM)
                   for _ in weights]
    out_specs = [pl.BlockSpec((tm, tgt_p), lambda i: (i, 0)),
                 pl.BlockSpec((tm, lat_p), lambda i: (i, 0))]

    y_pad, lat_pad = pl.pallas_call(
        functools.partial(mesnet_kernel, n_layers, dims_p),
        out_shape=(jax.ShapeDtypeStruct((Bp, tgt_p), out_dtype),
                   jax.ShapeDtypeStruct((Bp, lat_p), out_dtype)),
        grid_spec=pltpu.PrefetchScalarGridSpec(
            num_scalar_prefetch=0,
            grid=grid,
            in_specs=[x_spec] + param_specs,
            out_specs=out_specs),
        compiler_params=pltpu.CompilerParams(
            dimension_semantics=("parallel",),
            vmem_limit_bytes=vmem_limit),
        cost_estimate=cost,
    )(x_p, *weights)

    # Slice lane / batch padding off outside the kernel.
    return y_pad[:B, :target_dim], lat_pad[:B, :latent_dim]


# ----------------------------------------------------------------------------
# Deterministic parameter init matching nn.init.kaiming_uniform_ (fan_in,
# a=0 -> bound = sqrt(6 / fan_in)) + zero biases.  Weights stored as (in, out).
# ----------------------------------------------------------------------------
def kaiming_uniform(key, fan_in, fan_out):
    bound = jnp.sqrt(6.0 / fan_in)
    return jax.random.uniform(key, (fan_in, fan_out), dtype=jnp.float32,
                              minval=-bound, maxval=bound)


def init_mesnet_params(key, input_dim, target_dim, hidden_dim, n_layers, latent_dim):
    dims = []
    d_in = input_dim
    for _ in range(n_layers):
        dims.append((d_in, hidden_dim))
        d_in = hidden_dim
    dims.append((d_in, latent_dim))        # encoder latent linear
    dims.append((latent_dim, target_dim))  # output head

    params = []
    for (fi, fo) in dims:
        key, sub = jax.random.split(key)
        params.append((kaiming_uniform(sub, fi, fo), jnp.zeros((fo,), jnp.float32)))
    return params


# Pure-JAX reference (same cast placement as the kernel) for sanity checking.
def mesnet_ref(x, params, n_layers, compute_dtype=jnp.float32):
    h = x.astype(compute_dtype)
    for i in range(n_layers):
        w, b = params[i]
        a = jnp.dot(h, w.astype(compute_dtype),
                    preferred_element_type=jnp.float32) + b
        if i < n_layers - 1:
            a = jnp.maximum(a, 0.0)
        h = a.astype(compute_dtype)
    w_lat, b_lat = params[n_layers]
    latents = jnp.dot(h, w_lat.astype(compute_dtype),
                      preferred_element_type=jnp.float32) + b_lat
    w_out, b_out = params[n_layers + 1]
    y_pred = jnp.dot(latents.astype(compute_dtype), w_out.astype(compute_dtype),
                     preferred_element_type=jnp.float32) + b_out
    return y_pred, latents


if __name__ == "__main__":
    # Small shapes consistent with the module.
    batch = 16
    input_dim = 32
    hidden_dim = 32
    latent_dim = 32
    target_dim = 8
    n_layers = 2

    key = jax.random.PRNGKey(0)
    kx, kp = jax.random.split(key)

    x = jax.random.normal(kx, (batch, input_dim), dtype=jnp.float32)
    params = init_mesnet_params(kp, input_dim, target_dim, hidden_dim,
                                n_layers, latent_dim)

    # 1) f32 compute path: closely matches the PyTorch module numerics.
    prep32 = prepare_mesnet_params(params, n_layers, compute_dtype=jnp.float32)
    y32, l32 = mesnet_forward(x, prep32)
    jax.block_until_ready((y32, l32))
    y_ref, l_ref = mesnet_ref(x, params, n_layers, jnp.float32)
    assert jnp.allclose(y32, y_ref, atol=2e-4, rtol=2e-4)
    assert jnp.allclose(l32, l_ref, atol=2e-4, rtol=2e-4)

    # 2) Default bf16-matmul / f32-accumulate path (preferred on v6e/v7x).
    prep16 = prepare_mesnet_params(params, n_layers)            # bf16 weights
    y16, l16 = mesnet_forward(x, prep16)
    jax.block_until_ready((y16, l16))
    y_ref16, l_ref16 = mesnet_ref(x, params, n_layers, jnp.bfloat16)
    assert jnp.allclose(y16, y_ref16, atol=5e-3, rtol=5e-3)
    assert jnp.allclose(l16, l_ref16, atol=5e-3, rtol=5e-3)

    # 3) Non-multiple batch: exercises balanced tiles + grid >= 2 (v7x 2-TC path).
    xb = jax.random.normal(jax.random.PRNGKey(1), (40, input_dim), jnp.float32)
    yb, lb = mesnet_forward(xb, prep16, tm=256)
    jax.block_until_ready((yb, lb))
    yb_ref, lb_ref = mesnet_ref(xb, params, n_layers, jnp.bfloat16)
    assert jnp.allclose(yb, yb_ref, atol=1e-2, rtol=1e-2)
    assert jnp.allclose(lb, lb_ref, atol=1e-2, rtol=1e-2)

    print("KERNEL_OK")
</pallas_src>

<mosaic_0001>
module attributes {stable_mosaic.version = 11 : i64} {
  func.func @mesnet_kernel(%arg0: i32, %arg1: memref<16x128xf32, #tpu.memory_space<vmem>>, %arg2: memref<128x128xf32, #tpu.memory_space<vmem>>, %arg3: memref<1x128x128xf32, #tpu.memory_space<vmem>>, %arg4: memref<128x128xf32, #tpu.memory_space<vmem>>, %arg5: memref<128x128xf32, #tpu.memory_space<vmem>>, %arg6: memref<4x128xf32, #tpu.memory_space<vmem>>, %arg7: memref<16x128xf32, #tpu.memory_space<vmem>>, %arg8: memref<16x128xf32, #tpu.memory_space<vmem>>) attributes {dimension_semantics = [#tpu.dimension_semantics<parallel>], iteration_bounds = array<i64: 1>, scalar_prefetch = 0 : i64, scratch_operands = 0 : i64, tpu.core_type = #tpu.core_type<tc>, window_params = [{transform_indices = @transform_0, window_bounds = array<i64: 16, 128>}, {pipeline_mode = #tpu.pipeline_mode<synchronous>, transform_indices = @transform_1, window_bounds = array<i64: 128, 128>}, {pipeline_mode = #tpu.pipeline_mode<synchronous>, transform_indices = @transform_2, window_bounds = array<i64: 1, 128, 128>}, {pipeline_mode = #tpu.pipeline_mode<synchronous>, transform_indices = @transform_3, window_bounds = array<i64: 128, 128>}, {pipeline_mode = #tpu.pipeline_mode<synchronous>, transform_indices = @transform_4, window_bounds = array<i64: 128, 128>}, {pipeline_mode = #tpu.pipeline_mode<synchronous>, transform_indices = @transform_5, window_bounds = array<i64: 4, 128>}, {transform_indices = @transform_6, window_bounds = array<i64: 16, 128>}, {transform_indices = @transform_7, window_bounds = array<i64: 16, 128>}]} {
    %c0 = arith.constant 0 : index
    %c0_0 = arith.constant 0 : index
    %0 = vector.load %arg6[%c0, %c0_0] : memref<4x128xf32, #tpu.memory_space<vmem>>, vector<4x128xf32>
    %c0_1 = arith.constant 0 : index
    %c0_2 = arith.constant 0 : index
    %1 = vector.load %arg1[%c0_1, %c0_2] : memref<16x128xf32, #tpu.memory_space<vmem>>, vector<16x128xf32>
    %c0_3 = arith.constant 0 : index
    %c0_4 = arith.constant 0 : index
    %2 = vector.load %arg2[%c0_3, %c0_4] : memref<128x128xf32, #tpu.memory_space<vmem>>, vector<128x128xf32>
    %cst = arith.constant dense<0.000000e+00> : vector<16x128xf32>
    %3 = tpu.matmul %1, %2, %cst {dimension_numbers = #tpu.dot_dimension_numbers<[1], [0], [0], [1], [0, 0, 1, 1], [], []>} : vector<16x128xf32>, vector<128x128xf32>, vector<16x128xf32> -> vector<16x128xf32>
    %4 = vector.extract_strided_slice %0 {offsets = [0, 0], sizes = [1, 128], strides = [1, 1]} : vector<4x128xf32> to vector<1x128xf32>
    %5 = vector.broadcast %4 : vector<1x128xf32> to vector<16x128xf32>
    %6 = arith.addf %3, %5 : vector<16x128xf32>
    %cst_5 = arith.constant 0.000000e+00 : f32
    %7 = vector.broadcast %cst_5 : f32 to vector<16x128xf32>
    %8 = arith.maximumf %6, %7 : vector<16x128xf32>
    %c0_6 = arith.constant 0 : index
    %c0_7 = arith.constant 0 : index
    %c0_8 = arith.constant 0 : index
    %9 = vector.load %arg3[%c0_6, %c0_7, %c0_8] : memref<1x128x128xf32, #tpu.memory_space<vmem>>, vector<1x128x128xf32>
    %10 = vector.shape_cast %9 : vector<1x128x128xf32> to vector<128x128xf32>
    %cst_9 = arith.constant dense<0.000000e+00> : vector<16x128xf32>
    %11 = tpu.matmul %8, %10, %cst_9 {dimension_numbers = #tpu.dot_dimension_numbers<[1], [0], [0], [1], [0, 0, 1, 1], [], []>} : vector<16x128xf32>, vector<128x128xf32>, vector<16x128xf32> -> vector<16x128xf32>
    %12 = vector.extract_strided_slice %0 {offsets = [1, 0], sizes = [1, 128], strides = [1, 1]} : vector<4x128xf32> to vector<1x128xf32>
    %13 = vector.broadcast %12 : vector<1x128xf32> to vector<16x128xf32>
    %14 = arith.addf %11, %13 : vector<16x128xf32>
    %c0_10 = arith.constant 0 : index
    %c0_11 = arith.constant 0 : index
    %15 = vector.load %arg4[%c0_10, %c0_11] : memref<128x128xf32, #tpu.memory_space<vmem>>, vector<128x128xf32>
    %cst_12 = arith.constant dense<0.000000e+00> : vector<16x128xf32>
    %16 = tpu.matmul %14, %15, %cst_12 {dimension_numbers = #tpu.dot_dimension_numbers<[1], [0], [0], [1], [0, 0, 1, 1], [], []>} : vector<16x128xf32>, vector<128x128xf32>, vector<16x128xf32> -> vector<16x128xf32>
    %17 = vector.extract_strided_slice %0 {offsets = [2, 0], sizes = [1, 128], strides = [1, 1]} : vector<4x128xf32> to vector<1x128xf32>
    %18 = vector.broadcast %17 : vector<1x128xf32> to vector<16x128xf32>
    %19 = arith.addf %16, %18 : vector<16x128xf32>
    %c0_13 = arith.constant 0 : index
    %c0_14 = arith.constant 0 : index
    %20 = vector.load %arg5[%c0_13, %c0_14] : memref<128x128xf32, #tpu.memory_space<vmem>>, vector<128x128xf32>
    %cst_15 = arith.constant dense<0.000000e+00> : vector<16x128xf32>
    %21 = tpu.matmul %19, %20, %cst_15 {dimension_numbers = #tpu.dot_dimension_numbers<[1], [0], [0], [1], [0, 0, 1, 1], [], []>} : vector<16x128xf32>, vector<128x128xf32>, vector<16x128xf32> -> vector<16x128xf32>
    %22 = vector.extract_strided_slice %0 {offsets = [3, 0], sizes = [1, 128], strides = [1, 1]} : vector<4x128xf32> to vector<1x128xf32>
    %23 = vector.broadcast %22 : vector<1x128xf32> to vector<16x128xf32>
    %24 = arith.addf %21, %23 : vector<16x128xf32>
    %c0_16 = arith.constant 0 : index
    %c0_17 = arith.constant 0 : index
    %25 = vector.load %arg7[%c0_16, %c0_17] : memref<16x128xf32, #tpu.memory_space<vmem>>, vector<16x128xf32>
    tpu.vector_store %arg7[%c0_16, %c0_17], %24 {strides = array<i32>} : memref<16x128xf32, #tpu.memory_space<vmem>>, vector<16x128xf32>,
    %c0_18 = arith.constant 0 : index
    %c0_19 = arith.constant 0 : index
    %26 = vector.load %arg8[%c0_18, %c0_19] : memref<16x128xf32, #tpu.memory_space<vmem>>, vector<16x128xf32>
    tpu.vector_store %arg8[%c0_18, %c0_19], %19 {strides = array<i32>} : memref<16x128xf32, #tpu.memory_space<vmem>>, vector<16x128xf32>,
    return
  }
  func.func @transform_0(%arg0: i32) -> (i32, i32) {
    %c0_i32 = arith.constant 0 : i32
    %c0_i32_0 = arith.constant 0 : i32
    return %arg0, %c0_i32 : i32, i32
  }
  func.func @transform_1(%arg0: i32) -> (i32, i32) {
    %c0_i32 = arith.constant 0 : i32
    %c0_i32_0 = arith.constant 0 : i32
    %c0_i32_1 = arith.constant 0 : i32
    return %c0_i32, %c0_i32_0 : i32, i32
  }
  func.func @transform_2(%arg0: i32) -> (i32, i32, i32) {
    %c0_i32 = arith.constant 0 : i32
    %c0_i32_0 = arith.constant 0 : i32
    %c0_i32_1 = arith.constant 0 : i32
    %c0_i32_2 = arith.constant 0 : i32
    return %c0_i32, %c0_i32_0, %c0_i32_1 : i32, i32, i32
  }
  func.func @transform_3(%arg0: i32) -> (i32, i32) {
    %c0_i32 = arith.constant 0 : i32
    %c0_i32_0 = arith.constant 0 : i32
    %c0_i32_1 = arith.constant 0 : i32
    return %c0_i32, %c0_i32_0 : i32, i32
  }
  func.func @transform_4(%arg0: i32) -> (i32, i32) {
    %c0_i32 = arith.constant 0 : i32
    %c0_i32_0 = arith.constant 0 : i32
    %c0_i32_1 = arith.constant 0 : i32
    return %c0_i32, %c0_i32_0 : i32, i32
  }
  func.func @transform_5(%arg0: i32) -> (i32, i32) {
    %c0_i32 = arith.constant 0 : i32
    %c0_i32_0 = arith.constant 0 : i32
    %c0_i32_1 = arith.constant 0 : i32
    return %c0_i32, %c0_i32_0 : i32, i32
  }
  func.func @transform_6(%arg0: i32) -> (i32, i32) {
    %c0_i32 = arith.constant 0 : i32
    %c0_i32_0 = arith.constant 0 : i32
    return %arg0, %c0_i32 : i32, i32
  }
  func.func @transform_7(%arg0: i32) -> (i32, i32) {
    %c0_i32 = arith.constant 0 : i32
    %c0_i32_0 = arith.constant 0 : i32
    return %arg0, %c0_i32 : i32, i32
  }
}

</mosaic_0001>

<bundles_post_ra>
// kernel: tpu_custom_call.1
= control target key start
LH: loop header
LB: loop body
LE: loop exit
PB: predicated region body
PF: predicated region fallthrough
CT: control target
= control target key end

     0   :  { %13 = vsyncpa [#allocation3], 0  ;;  %s1215_s0 = inlined_call_operand.hbm [shape: f32[16,128], index: 0, kind: input, shape index: {}]   ;;  %s1216_s1 = inlined_call_operand.hbm [shape: f32[128,128], index: 1, kind: input, shape index: {}]   ;;  %s1217_s2 = inlined_call_operand.hbm [shape: f32[1,128,128], index: 2, kind: input, shape index: {}]   ;;  %s1218_s3 = inlined_call_operand.hbm [shape: f32[128,128], index: 3, kind: input, shape index: {}]   ;;  %s1219_s4 = inlined_call_operand.hbm [shape: f32[128,128], index: 4, kind: input, shape index: {}]   ;;  %s1220_s5 = inlined_call_operand.vmem [shape: f32[4,128], index: 5, kind: input, shape index: {}]   ;;  %s1221_s6 = inlined_call_operand.hbm [shape: f32[16,128], index: 6, kind: output, shape index: {0}]   ;;  %s1222_s7 = inlined_call_operand.hbm [shape: f32[16,128], index: 7, kind: output, shape index: {1}]  }
   0x1   :  { %14 = vsyncpa [#allocation6], 0 }
   0x2   :  { %15 = vsyncpa [#allocation9], 0 }
   0x3   :  { %16 = vsyncpa [#allocation4], 0 }
   0x4   :  { %17 = vsyncpa [#allocation13], 0  ;;  %s1032_s24 = smov [#allocation5]   ;;  %s1033_s26 = smov [#allocation8]  }
   0x5   :  { %s35_s25 = sshll.u32 %s1032_s24, 4  ;;  %s59_s27 = sshll.u32 %s1033_s26, 4  ;;  %s36_s25 = int_to_ptr.vmem [resolvable:$true] %s35_s25  ;;  %s1081_s27 = int_to_ptr.vmem [resolvable:$true] %s59_s27 }
   0x6   :  { %s868_s30 = scalar_lea.hbm %s1216_s1, 2048 }
   0x7   :  { %p869_p0 = scmp.ne.s32.totalorder %s1216_s1, %s868_s30  ;;  %p872_p1 = scmp.lt.u32.totalorder %s868_s30, %s1216_s1 }
   0x9   :  { %p874_p2 = pnand %p872_p1, %p869_p0 }
   0xb   :  { %877 = shalt.err (!%p874_p2)
}
   0xc   :  { %s878_s12 = scalar_lea.vmem %s36_s25, 2048  ;;  %p883_p4 = scmp.lt.s32.totalorder %s36_s25, %s36_s25 }
   0xd   :  { %p879_p3 = scmp.ne.s32.totalorder %s36_s25, %s878_s12  ;;  %p884_p5 = scmp.lt.s32.totalorder %s878_s12, %s878_s12 }
   0xf   :  { %p885_p6 = por %p884_p5, %p883_p4 }
  0x11   :  { %p886_p7 = pnand %p885_p6, %p879_p3 }
  0x13   :  { %889 = shalt.err (!%p886_p7)
}
  0x14   :  { %s1034_s13 = smov 128   ;;  %s1035_s14 = smov 8  }
  0x15   :  { %41 = dma.hbm_to_vmem [thread:$0]  %s1216_s1, 2048, %s36_s25, [#allocation6], %s1034_s13, %s1034_s13, %s1035_s14  }
  0x16   :  { %s890_s19 = scalar_lea.hbm %s1218_s3, 2048 }
  0x17   :  { %p891_p8 = scmp.ne.s32.totalorder %s1218_s3, %s890_s19  ;;  %p894_p9 = scmp.lt.u32.totalorder %s890_s19, %s1218_s3 }
  0x19   :  { %p896_p10 = pnand %p894_p9, %p891_p8 }
  0x1b   :  { %899 = shalt.err (!%p896_p10)
}
  0x1c   :  { %s900_s24 = scalar_lea.vmem %s1081_s27, 2048  ;;  %p905_p12 = scmp.lt.s32.totalorder %s1081_s27, %s1081_s27 }
  0x1d   :  { %p901_p11 = scmp.ne.s32.totalorder %s1081_s27, %s900_s24  ;;  %p906_p13 = scmp.lt.s32.totalorder %s900_s24, %s900_s24 }
  0x1f   :  { %p907_p0 = por %p906_p13, %p905_p12 }
  0x21   :  { %p908_p1 = pnand %p907_p0, %p901_p11 }
  0x23   :  { %911 = shalt.err (!%p908_p1)
}
  0x24   :  { %65 = dma.hbm_to_vmem [thread:$0]  %s1218_s3, 2048, %s1081_s27, [#allocation9], %s1034_s13, %s1034_s13, %s1035_s14  }
  0x25   :  { %s1036_s26 = smov [#allocation2]   ;;  %s1037_s29 = smov [#allocation7]  }
  0x26   :  { %s23_s28 = sshll.u32 %s1036_s26, 4  ;;  %s47_s30 = sshll.u32 %s1037_s29, 4  ;;  %s24_s28 = int_to_ptr.vmem [resolvable:$true] %s23_s28  ;;  %s1118_s30 = int_to_ptr.vmem [resolvable:$true] %s47_s30 }
  0x27   :  { %s912_s10 = scalar_lea.hbm %s1215_s0, 256 }
  0x28   :  { %p913_p2 = scmp.ne.s32.totalorder %s1215_s0, %s912_s10  ;;  %p916_p3 = scmp.lt.u32.totalorder %s912_s10, %s1215_s0 }
  0x2a   :  { %p918_p4 = pnand %p916_p3, %p913_p2 }
  0x2c   :  { %921 = shalt.err (!%p918_p4)
}
  0x2d   :  { %s922_s3 = scalar_lea.vmem %s24_s28, 256  ;;  %p927_p6 = scmp.lt.s32.totalorder %s24_s28, %s24_s28 }
  0x2e   :  { %p923_p5 = scmp.ne.s32.totalorder %s24_s28, %s922_s3  ;;  %p928_p7 = scmp.lt.s32.totalorder %s922_s3, %s922_s3 }
  0x30   :  { %p929_p8 = por %p928_p7, %p927_p6 }
  0x32   :  { %p930_p9 = pnand %p929_p8, %p923_p5 }
  0x34   :  { %933 = shalt.err (!%p930_p9)
}
  0x35   :  { %29 = dma.hbm_to_vmem [thread:$0]  %s1215_s0, 256, %s24_s28, [#allocation3], %s1034_s13, %s1034_s13, %s1035_s14  }
  0x36   :  { %s934_s20 = scalar_lea.hbm %s1217_s2, 2048 }
  0x37   :  { %p935_p10 = scmp.ne.s32.totalorder %s1217_s2, %s934_s20  ;;  %p938_p11 = scmp.lt.u32.totalorder %s934_s20, %s1217_s2 }
  0x39   :  { %p940_p12 = pnand %p938_p11, %p935_p10 }
  0x3b   :  { %943 = shalt.err (!%p940_p12)
}
  0x3c   :  { %s944_s1 = scalar_lea.vmem %s1118_s30, 2048  ;;  %p949_p0 = scmp.lt.s32.totalorder %s1118_s30, %s1118_s30 }
  0x3d   :  { %p945_p13 = scmp.ne.s32.totalorder %s1118_s30, %s944_s1  ;;  %p950_p1 = scmp.lt.s32.totalorder %s944_s1, %s944_s1 }
  0x3f   :  { %p951_p2 = por %p950_p1, %p949_p0 }
  0x41   :  { %p952_p3 = pnand %p951_p2, %p945_p13 }
  0x43   :  { %955 = shalt.err (!%p952_p3)
}
  0x44   :  { %53 = dma.hbm_to_vmem [thread:$0]  %s1217_s2, 2048, %s1118_s30, [#allocation6], %s1034_s13, %s1034_s13, %s1035_s14  }
  0x45   :  { %s1038_s26 = smov [#allocation10]   ;;  %s956_s9 = scalar_lea.hbm %s1219_s4, 2048 }
  0x46   :  { %s71_s28 = sshll.u32 %s1038_s26, 4  ;;  %p957_p4 = scmp.ne.s32.totalorder %s1219_s4, %s956_s9  ;;  %s72_s28 = int_to_ptr.vmem [resolvable:$true] %s71_s28 }
  0x47   :  { %p960_p5 = scmp.lt.u32.totalorder %s956_s9, %s1219_s4 }
  0x49   :  { %p962_p6 = pnand %p960_p5, %p957_p4 }
  0x4b   :  { %965 = shalt.err (!%p962_p6)
}
  0x4c   :  { %s966_s16 = scalar_lea.vmem %s72_s28, 2048  ;;  %p971_p8 = scmp.lt.s32.totalorder %s72_s28, %s72_s28 }
  0x4d   :  { %p967_p7 = scmp.ne.s32.totalorder %s72_s28, %s966_s16  ;;  %p972_p9 = scmp.lt.s32.totalorder %s966_s16, %s966_s16 }
  0x4f   :  { %p973_p10 = por %p972_p9, %p971_p8 }
  0x51   :  { %p974_p11 = pnand %p973_p10, %p967_p7 }
  0x53   :  { %977 = shalt.err (!%p974_p11)
}
  0x54   :  { %77 = dma.hbm_to_vmem [thread:$0]  %s1219_s4, 2048, %s72_s28, [#allocation9], %s1034_s13, %s1034_s13, %s1035_s14  }
  0x55   :  { %1022 = dma.done.wait [#allocation3], 256  }
  0x56   :  { %1023 = vsyncadd [#allocation3], 4294967040 }
  0x57   :  { %1024 = dma.done.wait [#allocation6], 4096  }
  0x58   :  { %1025 = vsyncadd [#allocation6], 4294963200 }
  0x59   :  { %1026 = dma.done.wait [#allocation9], 4096  }
  0x5a   :  { %1027 = vsyncadd [#allocation9], 4294963200  ;;  %v98_v0 = vld [vmem:[#allocation5] sm:$0xff]  ;;  %v99_v1 = vld [vmem:[#allocation5 + $0x8] sm:$0xff] }
  0x5b   :  { %v100_v2 = vld [vmem:[#allocation5 + $0x10] sm:$0xff]  ;;  %v731_v3 = vpack.c.bf16 %v99_v1, %v98_v0  ;;  %v101_v4 = vld [vmem:[#allocation5 + $0x18] sm:$0xff]  ;;  %v102_v6 = vld [vmem:[#allocation5 + $0x20] sm:$0xff] }
  0x5c   :  { %v735_v5 = vpack.c.bf16 %v101_v4, %v100_v2  ;;  %v103_v7 = vld [vmem:[#allocation5 + $0x28] sm:$0xff]  ;;  %v104_v9 = vld [vmem:[#allocation5 + $0x30] sm:$0xff]  ;;  %v105_v10 = vld [vmem:[#allocation5 + $0x38] sm:$0xff] }
  0x5d   :  { %732 = vmatprep.subr.bf16.mxu0 %v731_v3  ;;  %v739_v8 = vpack.c.bf16 %v103_v7, %v102_v6  ;;  %v96_v11 = vld [vmem:[#allocation2] sm:$0xff]  ;;  %v195_v12 = vld [vmem:[#allocation7] sm:$0xff]  ;;  %v196_v13 = vld [vmem:[#allocation7 + $0x8] sm:$0xff]  ;;  %v743_v20 = vpack.c.bf16 %v105_v10, %v104_v9  ;;  %v114_v7 = vlaneseq }
  0x5e   :  { %734 = vmatpush3.bf16.msra.mxu0 %v731_v3  ;;  %623 = vmatprep.mubr.f32.mxu0 %v96_v11  ;;  %v197_v14 = vld [vmem:[#allocation7 + $0x10] sm:$0xff]  ;;  %v763_v15 = vpack.c.bf16 %v196_v13, %v195_v12  ;;  %v198_v16 = vld [vmem:[#allocation7 + $0x18] sm:$0xff]  ;;  %v199_v18 = vld [vmem:[#allocation7 + $0x20] sm:$0xff] }
  0x5f   :  { %736 = vmatprep.subr.bf16.mxu0 %v735_v5  ;;  %v767_v17 = vpack.c.bf16 %v198_v16, %v197_v14  ;;  %v200_v19 = vld [vmem:[#allocation7 + $0x28] sm:$0xff]  ;;  %v106_v21 = vld [vmem:[#allocation5 + $0x40] sm:$0xff]  ;;  %v201_v24 = vld [vmem:[#allocation7 + $0x30] sm:$0xff] }
  0x60   :  { %764 = vmatprep.subr.bf16.mxu1 %v763_v15  ;;  %v107_v22 = vld [vmem:[#allocation5 + $0x48] sm:$0xff]  ;;  %v771_v23 = vpack.c.bf16 %v200_v19, %v199_v18  ;;  %v202_v25 = vld [vmem:[#allocation7 + $0x38] sm:$0xff]  ;;  %v108_v27 = vld [vmem:[#allocation5 + $0x50] sm:$0xff] }
  0x61   :  { %766 = vmatpush3.bf16.msra.mxu1 %v763_v15  ;;  %v747_v26 = vpack.c.bf16 %v107_v22, %v106_v21  ;;  %v109_v28 = vld [vmem:[#allocation5 + $0x58] sm:$0xff]  ;;  %v775_v29 = vpack.c.bf16 %v202_v25, %v201_v24  ;;  %v203_v30 = vld [vmem:[#allocation7 + $0x40] sm:$0xff]  ;;  %v204_v31 = vld [vmem:[#allocation7 + $0x48] sm:$0xff] }
  0x62   :  { %738 = vmatpush3.bf16.msra.mxu0 %v735_v5  ;;  %768 = vmatprep.subr.bf16.mxu1 %v767_v17  ;;  %v751_v32 = vpack.c.bf16 %v109_v28, %v108_v27  ;;  %v110_v33 = vld [vmem:[#allocation5 + $0x60] sm:$0xff]  ;;  %v111_v34 = vld [vmem:[#allocation5 + $0x68] sm:$0xff]  ;;  %v779_v35 = vpack.c.bf16 %v204_v31, %v203_v30  ;;  %v205_v36 = vld [vmem:[#allocation7 + $0x50] sm:$0xff] }
  0x63   :  { %740 = vmatprep.subr.bf16.mxu0 %v739_v8  ;;  %v206_v37 = vld [vmem:[#allocation7 + $0x58] sm:$0xff]  ;;  %v755_v38 = vpack.c.bf16 %v111_v34, %v110_v33  ;;  %v112_v39 = vld [vmem:[#allocation5 + $0x70] sm:$0xff]  ;;  %v207_v42 = vld [vmem:[#allocation7 + $0x60] sm:$0xff] }
  0x64   :  { %v113_v40 = vld [vmem:[#allocation5 + $0x78] sm:$0xff]  ;;  %v783_v41 = vpack.c.bf16 %v206_v37, %v205_v36  ;;  %v208_v43 = vld [vmem:[#allocation7 + $0x68] sm:$0xff]  ;;  %v209_v47 = vld [vmem:[#allocation7 + $0x70] sm:$0xff] }
  0x65   :  { %770 = vmatpush3.bf16.msra.mxu1 %v767_v17  ;;  %v759_v44 = vpack.c.bf16 %v113_v40, %v112_v39  ;;  %v787_v45 = vpack.c.bf16 %v208_v43, %v207_v42  ;;  %v97_v46 = vld [vmem:[#allocation2 + $0x8] sm:$0xff]  ;;  %v290_v50 = vld [vmem:[#allocation8] sm:$0xff]  ;;  %v291_v51 = vld [vmem:[#allocation8 + $0x8] sm:$0xff] }
  0x66   :  { %742 = vmatpush3.bf16.msra.mxu0 %v739_v8  ;;  %772 = vmatprep.subr.bf16.mxu1 %v771_v23  ;;  %v210_v48 = vld [vmem:[#allocation7 + $0x78] sm:$0xff]  ;;  %v292_v52 = vld [vmem:[#allocation8 + $0x10] sm:$0xff]  ;;  %v795_v53 = vpack.c.bf16 %v291_v51, %v290_v50  ;;  %v294_v56 = vld [vmem:[#allocation8 + $0x20] sm:$0xff]  ;;  %v1170_v8 = vshrl.u32 %v114_v7, 7 }
  0x67   :  { %744 = vmatprep.subr.bf16.mxu0 %v743_v20  ;;  %v791_v49 = vpack.c.bf16 %v210_v48, %v209_v47  ;;  %v293_v54 = vld [vmem:[#allocation8 + $0x18] sm:$0xff]  ;;  %v295_v57 = vld [vmem:[#allocation8 + $0x28] sm:$0xff]  ;;  %v296_v59 = vld [vmem:[#allocation8 + $0x30] sm:$0xff] }
  0x68   :  { %v799_v55 = vpack.c.bf16 %v293_v54, %v292_v52  ;;  %v803_v58 = vpack.c.bf16 %v295_v57, %v294_v56  ;;  %v297_v60 = vld [vmem:[#allocation8 + $0x38] sm:$0xff]  ;;  %v298_v62 = vld [vmem:[#allocation8 + $0x40] sm:$0xff]  ;;  %v299_v63 = vld [vmem:[#allocation8 + $0x48] sm:$0xff]  ;;  %v116_v9 = vsub.s32 0, %v1170_v8  ;;  %v213_v42 = vsub.s32 1, %v1170_v8 }
  0x69   :  { %774 = vmatpush3.bf16.msra.mxu1 %v771_v23  ;;  %v807_v61 = vpack.c.bf16 %v297_v60, %v296_v59  ;;  %v811_v0 = vpack.c.bf16 %v299_v63, %v298_v62  ;;  %v300_v1 = vld [vmem:[#allocation8 + $0x50] sm:$0xff]  ;;  %v301_v2 = vld [vmem:[#allocation8 + $0x58] sm:$0xff]  ;;  %v302_v4 = vld [vmem:[#allocation8 + $0x60] sm:$0xff]  ;;  %v308_v51 = vsub.s32 2, %v1170_v8 }
  0x6a   :  { %746 = vmatpush3.bf16.msra.mxu0 %v743_v20  ;;  %776 = vmatprep.subr.bf16.mxu1 %v775_v29  ;;  %v815_v3 = vpack.c.bf16 %v301_v2, %v300_v1  ;;  %v303_v5 = vld [vmem:[#allocation8 + $0x68] sm:$0xff]  ;;  %v1176_v10 = vld [vmem:[%s1220_s5] sm:$0xf]  ;;  %v305_v19 = vld [vmem:[#allocation8 + $0x78] sm:$0xff]  ;;  %s1039_s5 = smov [#allocation12]  }
  0x6b   :  { %748 = vmatprep.subr.bf16.mxu0 %v747_v26  ;;  %v819_v6 = vpack.c.bf16 %v303_v5, %v302_v4  ;;  %v117_v11 = vrot.slane %v1176_v10, %v116_v9  ;;  %v304_v18 = vld [vmem:[#allocation8 + $0x70] sm:$0xff]  ;;  %v385_v21 = vld [vmem:[#allocation10] sm:$0xff]  ;;  %v386_v22 = vld [vmem:[#allocation10 + $0x8] sm:$0xff]  ;;  %v214_v43 = vrot.slane %v1176_v10, %v213_v42  ;;  %v309_v52 = vrot.slane %v1176_v10, %v308_v51  ;;  %s501_s27 = sshll.u32 %s1039_s5, 4  ;;  %s502_s27 = int_to_ptr.vmem [resolvable:$true] %s501_s27 }
  0x6c   :  { %v823_v20 = vpack.c.bf16 %v305_v19, %v304_v18  ;;  %v387_v23 = vld [vmem:[#allocation10 + $0x10] sm:$0xff]  ;;  %v827_v24 = vpack.c.bf16 %v386_v22, %v385_v21  ;;  %v388_v25 = vld [vmem:[#allocation10 + $0x18] sm:$0xff]  ;;  %v389_v27 = vld [vmem:[#allocation10 + $0x20] sm:$0xff]  ;;  %s978_s17 = scalar_lea.vmem %s502_s27, 256  ;;  %p983_p13 = scmp.lt.s32.totalorder %s502_s27, %s502_s27 }
  0x6d   :  { %778 = vmatpush3.bf16.msra.mxu1 %v775_v29  ;;  %v390_v28 = vld [vmem:[#allocation10 + $0x28] sm:$0xff]  ;;  %v391_v30 = vld [vmem:[#allocation10 + $0x30] sm:$0xff]  ;;  %v392_v31 = vld [vmem:[#allocation10 + $0x38] sm:$0xff]  ;;  %p979_p12 = scmp.ne.s32.totalorder %s502_s27, %s978_s17  ;;  %p984_p0 = scmp.lt.s32.totalorder %s978_s17, %s978_s17 }
  0x6e   :  { %750 = vmatpush3.bf16.msra.mxu0 %v747_v26  ;;  %780 = vmatprep.subr.bf16.mxu1 %v779_v35  ;;  %v831_v26 = vpack.c.bf16 %v388_v25, %v387_v23  ;;  %v835_v29 = vpack.c.bf16 %v390_v28, %v389_v27  ;;  %v393_v33 = vld [vmem:[#allocation10 + $0x40] sm:$0xff]  ;;  %v394_v34 = vld [vmem:[#allocation10 + $0x48] sm:$0xff]  ;;  %v395_v36 = vld [vmem:[#allocation10 + $0x50] sm:$0xff] }
  0x6f   :  { %752 = vmatprep.subr.bf16.mxu0 %v751_v32  ;;  %v396_v37 = vld [vmem:[#allocation10 + $0x58] sm:$0xff]  ;;  %v397_v39 = vld [vmem:[#allocation10 + $0x60] sm:$0xff]  ;;  %v398_v40 = vld [vmem:[#allocation10 + $0x68] sm:$0xff]  ;;  %p985_p1 = por %p984_p0, %p983_p13 }
  0x70   :  { %v399_v48 = vld [vmem:[#allocation10 + $0x70] sm:$0xff] }
  0x71   :  { %782 = vmatpush3.bf16.msra.mxu1 %v779_v35  ;;  %v843_v35 = vpack.c.bf16 %v394_v34, %v393_v33  ;;  %p986_p2 = pnand %p985_p1, %p979_p12 }
  0x72   :  { %754 = vmatpush3.bf16.msra.mxu0 %v751_v32  ;;  %784 = vmatprep.subr.bf16.mxu1 %v783_v41  ;;  %v839_v32 = vpack.c.bf16 %v392_v31, %v391_v30 }
  0x73   :  { %756 = vmatprep.subr.bf16.mxu0 %v755_v38 }
  0x75   :  { %786 = vmatpush3.bf16.msra.mxu1 %v783_v41  ;;  %v851_v41 = vpack.c.bf16 %v398_v40, %v397_v39 }
  0x76   :  { %758 = vmatpush3.bf16.msra.mxu0 %v755_v38  ;;  %788 = vmatprep.subr.bf16.mxu1 %v787_v45  ;;  %v847_v38 = vpack.c.bf16 %v396_v37, %v395_v36 }
  0x77   :  { %760 = vmatprep.subr.bf16.mxu0 %v759_v44 }
  0x79   :  { %790 = vmatpush3.bf16.msra.mxu1 %v787_v45 }
  0x7a   :  { %762 = vmatpush3.bf16.msra.mxu0 %v759_v44  ;;  %792 = vmatprep.subr.bf16.mxu1 %v791_v49 }
  0x7b   :  { %796 = vmatprep.subr.bf16.mxu0 %v795_v53 }
  0x7d   :  { %624 = vmatmul.mubr.f32.vlgmr.msra.gmra.mrb[0].mxu0 %v97_v46  ;;  %794 = vmatpush3.bf16.msra.mxu1 %v791_v49  ;;  %v400_v49 = vld [vmem:[#allocation10 + $0x78] sm:$0xff] }
  0x7e   :  { %798 = vmatpush3.bf16.msra.mxu0 %v795_v53  ;;  %828 = vmatprep.subr.bf16.mxu1 %v827_v24  ;;  %v855_v50 = vpack.c.bf16 %v400_v49, %v399_v48 }
  0x7f   :  { %800 = vmatprep.subr.bf16.mxu0 %v799_v55 }
  0x82   :  { %802 = vmatpush3.bf16.msra.mxu0 %v799_v55 }
  0x83   :  { %804 = vmatprep.subr.bf16.mxu0 %v803_v58 }
  0x86   :  { %806 = vmatpush3.bf16.msra.mxu0 %v803_v58 }
  0x87   :  { %808 = vmatprep.subr.bf16.mxu0 %v807_v61 }
  0x8a   :  { %810 = vmatpush3.bf16.msra.mxu0 %v807_v61 }
  0x8b   :  { %812 = vmatprep.subr.bf16.mxu0 %v811_v0 }
  0x8e   :  { %814 = vmatpush3.bf16.msra.mxu0 %v811_v0 }
  0x8f   :  { %816 = vmatprep.subr.bf16.mxu0 %v815_v3 }
  0x92   :  { %818 = vmatpush3.bf16.msra.mxu0 %v815_v3 }
  0x93   :  { %820 = vmatprep.subr.bf16.mxu0 %v819_v6 }
  0x96   :  { %822 = vmatpush3.bf16.msra.mxu0 %v819_v6 }
  0x97   :  { %824 = vmatprep.subr.bf16.mxu0 %v823_v20 }
  0x9a   :  { %826 = vmatpush3.bf16.msra.mxu0 %v823_v20 }
 0x150   :  { %v625_v12 = vpop.f32.mrb[0].mxu0 }
 0x151   :  { %v190_v13 = vadd.f32 %v625_v12, %v117_v11  ;;  %v184_v14 = vpop.f32.mrb[1].mxu0 }
 0x152   :  { %v185_v15 = vadd.f32 %v184_v14, %v117_v11 }
 0x153   :  { %v194_v17 = vmax.f32 %v190_v13, 0.0 }
 0x154   :  { %v193_v16 = vmax.f32 %v185_v15, 0.0 }
 0x156   :  { %658 = vmatprep.mubr.f32.mxu1 %v193_v16 }
 0x157   :  { %659 = vmatmul.mubr.f32.vlgmr.msra.gmra.mrb[0].mxu1 %v194_v17 }
 0x158   :  { %830 = vmatpush3.bf16.msra.mxu1 %v827_v24 }
 0x159   :  { %832 = vmatprep.subr.bf16.mxu1 %v831_v26 }
 0x15c   :  { %834 = vmatpush3.bf16.msra.mxu1 %v831_v26 }
 0x15d   :  { %836 = vmatprep.subr.bf16.mxu1 %v835_v29 }
 0x160   :  { %838 = vmatpush3.bf16.msra.mxu1 %v835_v29 }
 0x161   :  { %840 = vmatprep.subr.bf16.mxu1 %v839_v32 }
 0x164   :  { %842 = vmatpush3.bf16.msra.mxu1 %v839_v32 }
 0x165   :  { %844 = vmatprep.subr.bf16.mxu1 %v843_v35 }
 0x168   :  { %846 = vmatpush3.bf16.msra.mxu1 %v843_v35 }
 0x169   :  { %848 = vmatprep.subr.bf16.mxu1 %v847_v38 }
 0x16c   :  { %850 = vmatpush3.bf16.msra.mxu1 %v847_v38 }
 0x16d   :  { %852 = vmatprep.subr.bf16.mxu1 %v851_v41 }
 0x170   :  { %854 = vmatpush3.bf16.msra.mxu1 %v851_v41 }
 0x171   :  { %856 = vmatprep.subr.bf16.mxu1 %v855_v50 }
 0x174   :  { %858 = vmatpush3.bf16.msra.mxu1 %v855_v50 }
 0x22a   :  { %v660_v44 = vpop.f32.mrb[0].mxu1 }
 0x22b   :  { %v281_v45 = vpop.f32.mrb[1].mxu1  ;;  %v287_v47 = vadd.f32 %v660_v44, %v214_v43 }
 0x22c   :  { %v282_v46 = vadd.f32 %v281_v45, %v214_v43 }
 0x22e   :  { %693 = vmatprep.mubr.f32.mxu0 %v282_v46 }
 0x22f   :  { %694 = vmatmul.mubr.f32.vlgmr.msra.gmra.mrb[2].mxu0 %v287_v47 }
 0x302   :  { %v695_v53 = vpop.f32.mrb[2].mxu0 }
 0x303   :  { %v382_v54 = vadd.f32 %v695_v53, %v309_v52  ;;  %v376_v55 = vpop.f32.mrb[3].mxu0 }
 0x304   :  { %v377_v56 = vadd.f32 %v376_v55, %v309_v52 }
 0x305   :  { %483 = vst [vmem:[#allocation12 + $0x8] sm:$0xff] %v382_v54 }
 0x306   :  { %482 = vst [vmem:[#allocation12] sm:$0xff] %v377_v56  ;;  %728 = vmatprep.mubr.f32.mxu1 %v377_v56 }
 0x307   :  { %729 = vmatmul.mubr.f32.vlgmr.msra.gmra.mrb[2].mxu1 %v382_v54 }
 0x308   :  { %989 = shalt.err (!%p986_p2)
}
 0x309   :  { %s990_s20 = scalar_lea.hbm %s1222_s7, 256 }
 0x30a   :  { %p991_p3 = scmp.ne.s32.totalorder %s1222_s7, %s990_s20  ;;  %p994_p4 = scmp.lt.u32.totalorder %s990_s20, %s1222_s7 }
 0x30c   :  { %p996_p5 = pnand %p994_p4, %p991_p3 }
 0x30e   :  { %999 = shalt.err (!%p996_p5)
}
 0x30f   :  { %507 = dma.vmem_to_hbm [thread:$0]  %s502_s27, 256, %s1222_s7, [#allocation13], %s1034_s13, %s1034_s13, %s1035_s14   ;;  %v403_v57 = vsub.s32 3, %v1170_v8 }
 0x310   :  { %s1040_s25 = smov [#allocation11]  }
 0x311   :  { %v404_v58 = vrot.slane %v1176_v10, %v403_v57  ;;  %s489_s26 = sshll.u32 %s1040_s25, 4  ;;  %s490_s26 = int_to_ptr.vmem [resolvable:$true] %s489_s26 }
 0x312   :  { %s1000_s28 = scalar_lea.vmem %s490_s26, 256  ;;  %p1005_p7 = scmp.lt.s32.totalorder %s490_s26, %s490_s26 }
 0x313   :  { %p1001_p6 = scmp.ne.s32.totalorder %s490_s26, %s1000_s28  ;;  %p1006_p8 = scmp.lt.s32.totalorder %s1000_s28, %s1000_s28 }
 0x315   :  { %p1007_p9 = por %p1006_p8, %p1005_p7 }
 0x317   :  { %p1008_p10 = pnand %p1007_p9, %p1001_p6 }
 0x3da   :  { %v730_v59 = vpop.f32.mrb[2].mxu1 }
 0x3db   :  { %v477_v60 = vadd.f32 %v730_v59, %v404_v58  ;;  %v471_v61 = vpop.f32.mrb[3].mxu1 }
 0x3dc   :  { %v472_v62 = vadd.f32 %v471_v61, %v404_v58 }
 0x3dd   :  { %481 = vst [vmem:[#allocation11 + $0x8] sm:$0xff] %v477_v60 }
 0x3de   :  { %480 = vst [vmem:[#allocation11] sm:$0xff] %v472_v62 }
 0x3df   :  { %1011 = shalt.err (!%p1008_p10)
}
 0x3e0   :  { %s1012_s8 = scalar_lea.hbm %s1221_s6, 256 }
 0x3e1   :  { %p1013_p11 = scmp.ne.s32.totalorder %s1221_s6, %s1012_s8  ;;  %p1016_p12 = scmp.lt.u32.totalorder %s1012_s8, %s1221_s6 }
 0x3e3   :  { %p1018_p13 = pnand %p1016_p12, %p1013_p11 }
 0x3e5   :  { %1021 = shalt.err (!%p1018_p13)
}
 0x3e6   :  { %495 = dma.vmem_to_hbm [thread:$0]  %s490_s26, 256, %s1221_s6, [#allocation4], %s1034_s13, %s1034_s13, %s1035_s14  }
 0x3e7   :  { %1028 = dma.done.wait [#allocation4], 256  }
 0x3e8   :  { %1029 = vsyncadd [#allocation4], 4294967040 }
 0x3e9   :  { %1030 = dma.done.wait [#allocation13], 256  }
 0x3ea   :  { %1031 = vsyncadd [#allocation13], 4294967040 }
 0x3eb   :  { %514 = vsyncpa [#allocation3], 1 }
 0x3ec   :  { %515 = vsyncpa [#allocation6], 1 }
 0x3ed   :  { %516 = vsyncpa [#allocation9], 1 }
 0x3ee   :  { %517 = vsyncpa [#allocation4], 1 }
 0x3ef   :  { %518 = vsyncpa [#allocation13], 1 }

</bundles_post_ra>
